<compile_context>
chip_gen: v5e
topology: v5e:2x2
jax: 0.10.0
libtpu: 0.0.40
codegen_flags: <defaults>
</compile_context>

<pallas_src>
import functools

import jax
import jax.numpy as jnp
from jax import lax
from jax.experimental import pallas as pl
from jax.experimental.pallas import tpu as pltpu


LANE = 128  # TPU lane width; fc output padded to this for lane-dense stores


def _choose_tile_b(batch):
    """MXU-friendly batch tile that divides `batch` with >= 2 grid steps.

    Prefers large tiles (MXU M-dim) while keeping >= 2 grid steps so v7x's two
    TensorCores can split the batch.  Small / ragged batches fall back to a
    single full-array block (always legal w.r.t. the (8, 128) constraint).
    """
    for t in (256, 128, 64, 32, 16, 8):
        if batch % t == 0 and batch // t >= 2:
            return t
    return batch


def _vmem_limit_bytes(*block_nbytes):
    # double-buffered pipelined blocks + headroom for compiler scratch
    return int(2 * sum(block_nbytes) + (8 << 20))


def _weight_spec(shape):
    # constant index_map: DMA'd once, resident in VMEM across grid steps
    return pl.BlockSpec(shape, lambda i: tuple(0 for _ in shape))


def _pooled_logits(cls_ref, wd_ref, bd_ref, wf_ref, bf_ref):
    """pooler dense (bf16 MXU, f32 acc) + tanh -> lane-padded itm fc.

    Returns [tile_B, LANE] f32 logits (columns >= num_classes are padding).
    """
    pooled = jnp.tanh(
        jnp.dot(cls_ref[...], wd_ref[...], preferred_element_type=jnp.float32)
        + bd_ref[...]                                            # [1, H] broadcast
    )                                                            # [tB, H] f32
    logits = (
        jnp.dot(pooled.astype(jnp.bfloat16), wf_ref[...],
                preferred_element_type=jnp.float32)
        + bf_ref[...]                                            # [1, LANE] broadcast
    )                                                            # [tB, LANE] f32
    return logits


def _itm_logits_kernel(cls_ref, wd_ref, bd_ref, wf_ref, bf_ref, logits_ref):
    logits_ref[...] = _pooled_logits(cls_ref, wd_ref, bd_ref, wf_ref, bf_ref)


def _itm_loss_kernel(cls_ref, wd_ref, bd_ref, wf_ref, bf_ref, lbl_ref,
                     logits_ref, stats_ref, *, num_classes):
    logits = _pooled_logits(cls_ref, wd_ref, bd_ref, wf_ref, bf_ref)
    logits_ref[...] = logits                                     # lane-dense store

    # Cross-entropy over the first `num_classes` (real) columns only.
    col = lax.broadcasted_iota(jnp.int32, logits.shape, 1)       # [tB, LANE]
    z = jnp.where(col < num_classes, logits, jnp.float32(-1e30))
    m = jnp.max(z, axis=-1, keepdims=True)                       # [tB, 1]
    # exp(-1e30 - m) underflows to 0, so padded lanes drop out of the sum
    lse = m + jnp.log(jnp.sum(jnp.exp(z - m), axis=-1, keepdims=True))

    labels = lbl_ref[...]                                        # [tB, 1] int32
    picked = jnp.sum(jnp.where(col == labels, logits, 0.0),
                     axis=-1, keepdims=True)                     # [tB, 1]

    # nn.CrossEntropyLoss ignore_index=-100: ignored rows contribute neither
    # to the numerator nor to the mean denominator.
    valid = (labels >= 0).astype(jnp.float32)                    # [tB, 1]
    nll = valid * (lse - picked)                                 # [tB, 1]
    # lane 0: per-row nll (0 for ignored rows); lane 1: per-row valid flag.
    stats_ref[...] = jnp.where(col == 0, nll, jnp.where(col == 1, valid, 0.0))


@functools.partial(jax.jit, static_argnames=("num_classes",))
def itm_head_logits(cls_bf16, w_dense, b_dense, w_fc_pad, b_fc_pad, *, num_classes):
    """cls_bf16: [B, H]; weights as [in, out] bf16; biases f32; fc lane-padded."""
    B, H = cls_bf16.shape
    tile_b = _choose_tile_b(B)
    grid = (B // tile_b,)
    logits_pad = pl.pallas_call(
        _itm_logits_kernel,
        out_shape=jax.ShapeDtypeStruct((B, LANE), jnp.float32),
        grid=grid,
        in_specs=[
            pl.BlockSpec((tile_b, H), lambda i: (i, 0)),   # CLS rows (bf16)
            _weight_spec((H, H)),                          # pooler dense weight
            _weight_spec((1, H)),                          # pooler dense bias (f32)
            _weight_spec((H, LANE)),                       # itm fc weight, lane-padded
            _weight_spec((1, LANE)),                       # itm fc bias, lane-padded
        ],
        out_specs=pl.BlockSpec((tile_b, LANE), lambda i: (i, 0)),
        compiler_params=pltpu.CompilerParams(
            dimension_semantics=("parallel",),
            vmem_limit_bytes=_vmem_limit_bytes(
                tile_b * H * 2, H * H * 2, H * 4, H * LANE * 2, LANE * 4,
                tile_b * LANE * 4)),
    )(cls_bf16, w_dense, b_dense, w_fc_pad, b_fc_pad)
    return logits_pad[:, :num_classes]


@functools.partial(jax.jit, static_argnames=("num_classes",))
def itm_head_logits_loss(cls_bf16, w_dense, b_dense, w_fc_pad, b_fc_pad, labels,
                         *, num_classes):
    B, H = cls_bf16.shape
    tile_b = _choose_tile_b(B)
    grid = (B // tile_b,)
    labels2d = labels.astype(jnp.int32).reshape(B, 1)
    kernel = functools.partial(_itm_loss_kernel, num_classes=num_classes)
    logits_pad, stats = pl.pallas_call(
        kernel,
        out_shape=(
            jax.ShapeDtypeStruct((B, LANE), jnp.float32),   # lane-dense logits slab
            jax.ShapeDtypeStruct((B, LANE), jnp.float32),   # per-row (nll, valid)
        ),
        grid=grid,
        in_specs=[
            pl.BlockSpec((tile_b, H), lambda i: (i, 0)),
            _weight_spec((H, H)),
            _weight_spec((1, H)),
            _weight_spec((H, LANE)),
            _weight_spec((1, LANE)),
            pl.BlockSpec((tile_b, 1), lambda i: (i, 0)),    # int32 labels
        ],
        out_specs=(
            pl.BlockSpec((tile_b, LANE), lambda i: (i, 0)),
            pl.BlockSpec((tile_b, LANE), lambda i: (i, 0)),
        ),
        compiler_params=pltpu.CompilerParams(
            dimension_semantics=("parallel",),
            vmem_limit_bytes=_vmem_limit_bytes(
                tile_b * H * 2, H * H * 2, H * 4, H * LANE * 2, LANE * 4,
                tile_b * 4, 2 * tile_b * LANE * 4)),
    )(cls_bf16, w_dense, b_dense, w_fc_pad, b_fc_pad, labels2d)
    # Mean over non-ignored rows (tiny XLA reduce).  0/0 -> NaN on an
    # all-ignored batch, matching nn.CrossEntropyLoss semantics.
    loss = jnp.sum(stats[:, 0]) / jnp.sum(stats[:, 1])
    return logits_pad[:, :num_classes], loss


class ViltForPreTrainPallas:
    """Synthetic, deterministic re-implementation of the ITM head path."""

    def __init__(self, hidden_size=32, num_classes=2, seed=0):
        self.hidden_size = hidden_size
        self.num_classes = num_classes
        k = jax.random.PRNGKey(seed)
        k1, k2, k3, k4 = jax.random.split(k, 4)
        # deterministic "checkpoint" masters (vilt.pooler.dense.*, itm_score.fc.*)
        self.w_dense = (jax.random.normal(k1, (hidden_size, hidden_size),
                                          jnp.float32) * 0.02)
        self.b_dense = (jax.random.normal(k2, (1, hidden_size),
                                          jnp.float32) * 0.02)
        self.w_fc = (jax.random.normal(k3, (hidden_size, num_classes),
                                       jnp.float32) * 0.02)
        self.b_fc = (jax.random.normal(k4, (1, num_classes),
                                       jnp.float32) * 0.02)
        # kernel operands, built once outside the hot path:
        #   * bf16 matmul weights (MXU path, f32 accumulation in-kernel)
        #   * fc weight/bias zero-padded to LANE columns for unmasked stores
        self.w_dense_bf16 = self.w_dense.astype(jnp.bfloat16)
        w_fc_pad = (jnp.zeros((hidden_size, LANE), jnp.float32)
                    .at[:, :num_classes].set(self.w_fc))
        self.w_fc_pad_bf16 = w_fc_pad.astype(jnp.bfloat16)
        self.b_fc_pad = (jnp.zeros((1, LANE), jnp.float32)
                         .at[:, :num_classes].set(self.b_fc))

    def forward_itm(self, last_hidden_state, labels=None):
        """last_hidden_state: [B, S, H] (batch, seq, hidden)."""
        # CLS slice in the wrapper: reads only B*H from HBM (vs B*S*H before).
        cls_bf16 = last_hidden_state[:, 0, :].astype(jnp.bfloat16)
        if labels is None:
            logits = itm_head_logits(cls_bf16, self.w_dense_bf16, self.b_dense,
                                     self.w_fc_pad_bf16, self.b_fc_pad,
                                     num_classes=self.num_classes)
            return logits, None
        logits, loss = itm_head_logits_loss(cls_bf16, self.w_dense_bf16,
                                            self.b_dense, self.w_fc_pad_bf16,
                                            self.b_fc_pad, labels,
                                            num_classes=self.num_classes)
        return logits, loss


def _reference_itm(model, last_hidden_state, labels):
    """Pure-JAX reference mirroring the kernel's bf16-matmul / f32-epilogue."""
    cls = last_hidden_state[:, 0, :].astype(jnp.bfloat16)
    pooled = jnp.tanh(
        jnp.dot(cls, model.w_dense_bf16, preferred_element_type=jnp.float32)
        + model.b_dense)
    logits = (jnp.dot(pooled.astype(jnp.bfloat16),
                      model.w_fc_pad_bf16[:, :model.num_classes],
                      preferred_element_type=jnp.float32)
              + model.b_fc_pad[:, :model.num_classes])
    if labels is None:
        return logits, None
    logp = jax.nn.log_softmax(logits, axis=-1)
    valid = labels >= 0
    safe = jnp.where(valid, labels, 0)
    nll = -jnp.take_along_axis(logp, safe[:, None], axis=-1)[:, 0]
    nll = jnp.where(valid, nll, 0.0)
    loss = jnp.sum(nll) / jnp.sum(valid.astype(jnp.float32))
    return logits, loss


if __name__ == "__main__":
    B, S, H = 2, 8, 32
    key = jax.random.PRNGKey(0)
    k_hidden, k_labels = jax.random.split(key)
    # stand-in for the last hidden state produced by the pretrained ViLT backbone
    last_hidden_state = jax.random.normal(k_hidden, (B, S, H), jnp.float32)
    labels = jax.random.randint(k_labels, (B,), 0, 2, jnp.int32)

    model = ViltForPreTrainPallas(hidden_size=H, num_classes=2, seed=0)

    # tolerances account for the (intentional) bf16 matmul path
    ATOL = RTOL = 1e-3

    # labels path
    logits, loss = model.forward_itm(last_hidden_state, labels=labels)
    jax.block_until_ready((logits, loss))
    ref_logits, ref_loss = _reference_itm(model, last_hidden_state, labels)
    assert jnp.allclose(logits, ref_logits, atol=ATOL, rtol=RTOL)
    assert jnp.allclose(loss, ref_loss, atol=ATOL, rtol=RTOL)

    # ignore_index=-100 path (matches nn.CrossEntropyLoss semantics)
    labels_ign = jnp.array([int(labels[0]), -100], jnp.int32)
    logits_i, loss_i = model.forward_itm(last_hidden_state, labels=labels_ign)
    jax.block_until_ready((logits_i, loss_i))
    ref_logits_i, ref_loss_i = _reference_itm(model, last_hidden_state, labels_ign)
    assert jnp.allclose(logits_i, ref_logits_i, atol=ATOL, rtol=RTOL)
    assert jnp.allclose(loss_i, ref_loss_i, atol=ATOL, rtol=RTOL)

    # labels=None path (returns (logits, None) like the PyTorch module)
    logits_only, none_loss = model.forward_itm(last_hidden_state, labels=None)
    jax.block_until_ready(logits_only)
    assert none_loss is None
    assert jnp.allclose(logits_only, ref_logits, atol=ATOL, rtol=RTOL)

    print("KERNEL_OK")
</pallas_src>

<mosaic_0001>
module attributes {stable_mosaic.version = 11 : i64} {
  func.func @_itm_loss_kernel(%arg0: i32, %arg1: memref<2x32xbf16, #tpu.memory_space<vmem>>, %arg2: memref<32x32xbf16, #tpu.memory_space<vmem>>, %arg3: memref<1x32xf32, #tpu.memory_space<vmem>>, %arg4: memref<32x128xbf16, #tpu.memory_space<vmem>>, %arg5: memref<1x128xf32, #tpu.memory_space<vmem>>, %arg6: memref<2x1xi32, #tpu.memory_space<vmem>>, %arg7: memref<2x128xf32, #tpu.memory_space<vmem>>, %arg8: memref<2x128xf32, #tpu.memory_space<vmem>>) attributes {dimension_semantics = [#tpu.dimension_semantics<parallel>], iteration_bounds = array<i64: 1>, scalar_prefetch = 0 : i64, scratch_operands = 0 : i64, tpu.core_type = #tpu.core_type<tc>, window_params = [{transform_indices = @transform_0, window_bounds = array<i64: 2, 32>}, {pipeline_mode = #tpu.pipeline_mode<synchronous>, transform_indices = @transform_1, window_bounds = array<i64: 32, 32>}, {pipeline_mode = #tpu.pipeline_mode<synchronous>, transform_indices = @transform_2, window_bounds = array<i64: 1, 32>}, {pipeline_mode = #tpu.pipeline_mode<synchronous>, transform_indices = @transform_3, window_bounds = array<i64: 32, 128>}, {pipeline_mode = #tpu.pipeline_mode<synchronous>, transform_indices = @transform_4, window_bounds = array<i64: 1, 128>}, {transform_indices = @transform_5, window_bounds = array<i64: 2, 1>}, {transform_indices = @transform_6, window_bounds = array<i64: 2, 128>}, {transform_indices = @transform_7, window_bounds = array<i64: 2, 128>}]} {
    %c0 = arith.constant 0 : index
    %c0_0 = arith.constant 0 : index
    %0 = vector.load %arg1[%c0, %c0_0] : memref<2x32xbf16, #tpu.memory_space<vmem>>, vector<2x32xbf16>
    %c0_1 = arith.constant 0 : index
    %c0_2 = arith.constant 0 : index
    %1 = vector.load %arg2[%c0_1, %c0_2] : memref<32x32xbf16, #tpu.memory_space<vmem>>, vector<32x32xbf16>
    %cst = arith.constant dense<0.000000e+00> : vector<2x32xf32>
    %2 = tpu.matmul %0, %1, %cst {dimension_numbers = #tpu.dot_dimension_numbers<[1], [0], [0], [1], [0, 0, 1, 1], [], []>} : vector<2x32xbf16>, vector<32x32xbf16>, vector<2x32xf32> -> vector<2x32xf32>
    %c0_3 = arith.constant 0 : index
    %c0_4 = arith.constant 0 : index
    %3 = vector.load %arg3[%c0_3, %c0_4] : memref<1x32xf32, #tpu.memory_space<vmem>>, vector<1x32xf32>
    %4 = vector.broadcast %3 : vector<1x32xf32> to vector<2x32xf32>
    %5 = arith.addf %2, %4 : vector<2x32xf32>
    %6 = math.tanh %5 : vector<2x32xf32>
    %7 = arith.truncf %6 : vector<2x32xf32> to vector<2x32xbf16>
    %c0_5 = arith.constant 0 : index
    %c0_6 = arith.constant 0 : index
    %8 = vector.load %arg4[%c0_5, %c0_6] : memref<32x128xbf16, #tpu.memory_space<vmem>>, vector<32x128xbf16>
    %cst_7 = arith.constant dense<0.000000e+00> : vector<2x128xf32>
    %9 = tpu.matmul %7, %8, %cst_7 {dimension_numbers = #tpu.dot_dimension_numbers<[1], [0], [0], [1], [0, 0, 1, 1], [], []>} : vector<2x32xbf16>, vector<32x128xbf16>, vector<2x128xf32> -> vector<2x128xf32>
    %c0_8 = arith.constant 0 : index
    %c0_9 = arith.constant 0 : index
    %10 = vector.load %arg5[%c0_8, %c0_9] : memref<1x128xf32, #tpu.memory_space<vmem>>, vector<1x128xf32>
    %11 = vector.broadcast %10 : vector<1x128xf32> to vector<2x128xf32>
    %12 = arith.addf %9, %11 : vector<2x128xf32>
    %c0_10 = arith.constant 0 : index
    %c0_11 = arith.constant 0 : index
    %13 = vector.load %arg7[%c0_10, %c0_11] : memref<2x128xf32, #tpu.memory_space<vmem>>, vector<2x128xf32>
    tpu.vector_store %arg7[%c0_10, %c0_11], %12 {strides = array<i32>} : memref<2x128xf32, #tpu.memory_space<vmem>>, vector<2x128xf32>,
    %14 = tpu.iota {dimensions = array<i32: 1>} : vector<2x128xi32>
    %c2_i32 = arith.constant 2 : i32
    %15 = vector.broadcast %c2_i32 : i32 to vector<2x128xi32>
    %16 = arith.cmpi slt, %14, %15 : vector<2x128xi32>
    %cst_12 = arith.constant -1.000000e+30 : f32
    %17 = vector.broadcast %cst_12 : f32 to vector<2x128xf32>
    %18 = arith.select %16, %12, %17 : vector<2x128xi1>, vector<2x128xf32>
    %cst_13 = arith.constant dense<0xFF800000> : vector<2xf32>
    %19 = vector.multi_reduction <maximumf>, %18, %cst_13 [1] : vector<2x128xf32> to vector<2xf32>
    %20 = vector.shape_cast %19 : vector<2xf32> to vector<2x1xf32>
    %21 = vector.broadcast %20 : vector<2x1xf32> to vector<2x128xf32>
    %22 = arith.subf %18, %21 : vector<2x128xf32>
    %23 = math.exp %22 : vector<2x128xf32>
    %cst_14 = arith.constant dense<0.000000e+00> : vector<2xf32>
    %24 = vector.multi_reduction <add>, %23, %cst_14 [1] : vector<2x128xf32> to vector<2xf32>
    %25 = vector.shape_cast %24 : vector<2xf32> to vector<2x1xf32>
    %26 = math.log %25 : vector<2x1xf32>
    %27 = arith.addf %20, %26 : vector<2x1xf32>
    %c0_15 = arith.constant 0 : index
    %c0_16 = arith.constant 0 : index
    %28 = vector.load %arg6[%c0_15, %c0_16] : memref<2x1xi32, #tpu.memory_space<vmem>>, vector<2x1xi32>
    %29 = vector.broadcast %28 : vector<2x1xi32> to vector<2x128xi32>
    %30 = arith.cmpi eq, %14, %29 : vector<2x128xi32>
    %cst_17 = arith.constant 0.000000e+00 : f32
    %31 = vector.broadcast %cst_17 : f32 to vector<2x128xf32>
    %32 = arith.select %30, %12, %31 : vector<2x128xi1>, vector<2x128xf32>
    %cst_18 = arith.constant dense<0.000000e+00> : vector<2xf32>
    %33 = vector.multi_reduction <add>, %32, %cst_18 [1] : vector<2x128xf32> to vector<2xf32>
    %34 = vector.shape_cast %33 : vector<2xf32> to vector<2x1xf32>
    %c0_i32 = arith.constant 0 : i32
    %35 = vector.broadcast %c0_i32 : i32 to vector<2x1xi32>
    %36 = arith.cmpi sge, %28, %35 : vector<2x1xi32>
    %37 = arith.extui %36 : vector<2x1xi1> to vector<2x1xi32>
    %38 = arith.sitofp %37 : vector<2x1xi32> to vector<2x1xf32>
    %39 = arith.subf %27, %34 : vector<2x1xf32>
    %40 = arith.mulf %38, %39 : vector<2x1xf32>
    %c0_i32_19 = arith.constant 0 : i32
    %41 = vector.broadcast %c0_i32_19 : i32 to vector<2x128xi32>
    %42 = arith.cmpi eq, %14, %41 : vector<2x128xi32>
    %c1_i32 = arith.constant 1 : i32
    %43 = vector.broadcast %c1_i32 : i32 to vector<2x128xi32>
    %44 = arith.cmpi eq, %14, %43 : vector<2x128xi32>
    %cst_20 = arith.constant 0.000000e+00 : f32
    %45 = vector.shape_cast %38 : vector<2x1xf32> to vector<2x1xf32>
    %46 = vector.broadcast %45 : vector<2x1xf32> to vector<2x128xf32>
    %47 = vector.broadcast %cst_20 : f32 to vector<2x128xf32>
    %48 = arith.select %44, %46, %47 : vector<2x128xi1>, vector<2x128xf32>
    %49 = vector.shape_cast %40 : vector<2x1xf32> to vector<2x1xf32>
    %50 = vector.broadcast %49 : vector<2x1xf32> to vector<2x128xf32>
    %51 = arith.select %42, %50, %48 : vector<2x128xi1>, vector<2x128xf32>
    %c0_21 = arith.constant 0 : index
    %c0_22 = arith.constant 0 : index
    %52 = vector.load %arg8[%c0_21, %c0_22] : memref<2x128xf32, #tpu.memory_space<vmem>>, vector<2x128xf32>
    tpu.vector_store %arg8[%c0_21, %c0_22], %51 {strides = array<i32>} : memref<2x128xf32, #tpu.memory_space<vmem>>, vector<2x128xf32>,
    return
  }
  func.func @transform_0(%arg0: i32) -> (i32, i32) {
    %c0_i32 = arith.constant 0 : i32
    %c0_i32_0 = arith.constant 0 : i32
    return %arg0, %c0_i32 : i32, i32
  }
  func.func @transform_1(%arg0: i32) -> (i32, i32) {
    %c0_i32 = arith.constant 0 : i32
    %c0_i32_0 = arith.constant 0 : i32
    %c0_i32_1 = arith.constant 0 : i32
    return %c0_i32, %c0_i32_0 : i32, i32
  }
  func.func @transform_2(%arg0: i32) -> (i32, i32) {
    %c0_i32 = arith.constant 0 : i32
    %c0_i32_0 = arith.constant 0 : i32
    %c0_i32_1 = arith.constant 0 : i32
    return %c0_i32, %c0_i32_0 : i32, i32
  }
  func.func @transform_3(%arg0: i32) -> (i32, i32) {
    %c0_i32 = arith.constant 0 : i32
    %c0_i32_0 = arith.constant 0 : i32
    %c0_i32_1 = arith.constant 0 : i32
    return %c0_i32, %c0_i32_0 : i32, i32
  }
  func.func @transform_4(%arg0: i32) -> (i32, i32) {
    %c0_i32 = arith.constant 0 : i32
    %c0_i32_0 = arith.constant 0 : i32
    %c0_i32_1 = arith.constant 0 : i32
    return %c0_i32, %c0_i32_0 : i32, i32
  }
  func.func @transform_5(%arg0: i32) -> (i32, i32) {
    %c0_i32 = arith.constant 0 : i32
    %c0_i32_0 = arith.constant 0 : i32
    return %arg0, %c0_i32 : i32, i32
  }
  func.func @transform_6(%arg0: i32) -> (i32, i32) {
    %c0_i32 = arith.constant 0 : i32
    %c0_i32_0 = arith.constant 0 : i32
    return %arg0, %c0_i32 : i32, i32
  }
  func.func @transform_7(%arg0: i32) -> (i32, i32) {
    %c0_i32 = arith.constant 0 : i32
    %c0_i32_0 = arith.constant 0 : i32
    return %arg0, %c0_i32 : i32, i32
  }
}

</mosaic_0001>

<bundles_post_ra>
// kernel: itm_head_logits_loss.1
= control target key start
LH: loop header
LB: loop body
LE: loop exit
PB: predicated region body
PF: predicated region fallthrough
CT: control target
= control target key end

     0   :  { %13 = vsyncpa [#allocation3], 0  ;;  %s396_s0 = inlined_call_operand.vmem [shape: bf16[2,32], index: 0, kind: input, shape index: {}]   ;;  %s397_s1 = inlined_call_operand.hbm [shape: bf16[32,32], index: 1, kind: input, shape index: {}]   ;;  %s398_s2 = inlined_call_operand.vmem [shape: f32[1,32], index: 2, kind: input, shape index: {}]   ;;  %s399_s3 = inlined_call_operand.hbm [shape: bf16[32,128], index: 3, kind: input, shape index: {}]   ;;  %s400_s4 = inlined_call_operand.vmem [shape: f32[1,128], index: 4, kind: input, shape index: {}]   ;;  %s401_s5 = inlined_call_operand.vmem [shape: s32[2,1], index: 5, kind: input, shape index: {}]   ;;  %s402_s6 = inlined_call_operand.hbm [shape: f32[2,128], index: 6, kind: output, shape index: {0}]   ;;  %s403_s7 = inlined_call_operand.vmem [shape: f32[2,128], index: 7, kind: output, shape index: {1}]  }
   0x1   :  { %14 = vsyncpa [#allocation6], 0 }
   0x2   :  { %15 = vsyncpa [#allocation4], 0  ;;  %s22_s26 = sshll.u32 %s397_s1, 4  ;;  %s322_s27 = smov [#allocation2]   ;;  %s23_s26 = int_to_ptr.hbm [resolvable:$true] %s22_s26 }
   0x3   :  { %s24_s28 = sshll.u32 %s322_s27, 4  ;;  %s37_s8 = sshll.u32 %s399_s3, 4  ;;  %s25_s28 = int_to_ptr.vmem [resolvable:$true] %s24_s28  ;;  %s38_s8 = int_to_ptr.hbm [resolvable:$true] %s37_s8 }
   0x4   :  { %s323_s9 = smov 64   ;;  %s324_s10 = smov 4  }
   0x5   :  { %30 = dma.hbm_to_vmem [thread:$0]  %s23_s26, 256, %s25_s28, [#allocation3], %s323_s9, %s323_s9, %s324_s10  }
   0x6   :  { %s325_s11 = smov [#allocation5]  }
   0x7   :  { %s39_s12 = sshll.u32 %s325_s11, 4  ;;  %s40_s12 = int_to_ptr.vmem [resolvable:$true] %s39_s12 }
   0x8   :  { %45 = dma.hbm_to_vmem [thread:$0]  %s38_s8, 256, %s40_s12, [#allocation6], %s323_s9, %s323_s9, %s324_s10  }
   0x9   :  { %316 = dma.done.wait [#allocation3], 256  }
   0xa   :  { %317 = vsyncadd [#allocation3], 4294967040 }
   0xb   :  { %318 = dma.done.wait [#allocation6], 256  }
   0xc   :  { %319 = vsyncadd [#allocation6], 4294967040  ;;  %v224_v0 = vld [vmem:[#allocation2 + $0x8] sm:$0xff]  ;;  %v223_v1 = vld [vmem:[#allocation2] sm:$0xff]  ;;  %vm80_vm0 = vcmask 261120   ;;  %v326_v11 = vmov 0   ;;  %v136_v12 = vlaneseq }
   0xd   :  { %90 = vmatpush.bf16.msra.mxu0 %v224_v0  ;;  %v59_v2 = vld [vmem:[%s396_s0] sm:$0x1]  ;;  %v226_v3 = vld [vmem:[#allocation5 + $0x8] sm:$0xff]  ;;  %v225_v4 = vld [vmem:[#allocation5] sm:$0xff]  ;;  %234 = vset.pattern.permute.xlu0 %v326_v11  ;;  %vm140_vm2 = vcmask 1041408   ;;  %v327_v29 = vmov 0.0  }
   0xe   :  { %128 = vmatpush.bf16.msra.mxu1 %v226_v3  ;;  %v236_v5 = vld [vmem:[%s398_s2] ss:$0 sm:$0xff]  ;;  %235 = vset.pattern.permute.xlu2 %v326_v11  ;;  %v137_v13 = vand.u32 127, %v136_v12  ;;  %s189_s19 = sshll.u32 %s402_s6, 4  ;;  %s190_s19 = int_to_ptr.hbm [resolvable:$true] %s189_s19 }
   0xf   :  { %v237_v14 = vld [vmem:[%s400_s4] ss:$0 sm:$0xff]  ;;  %s328_s4 = smov [#allocation7]  }
  0x10   :  { %vm138_vm1 = vcmp.lt.s32.totalorder %v137_v13, 2  ;;  %v153_v20 = vld [vmem:[%s401_s5] sm:$0x3]  ;;  %s187_s5 = sshll.u32 %s328_s4, 4  ;;  %vm168_vm5 = vcmp.eq.s32.totalorder %v137_v13, 1  ;;  %vm167_vm6 = vcmp.eq.s32.totalorder %v137_v13, 0  ;;  %s188_s5 = int_to_ptr.vmem [resolvable:$true] %s187_s5 }
  0x11   :  { %91 = vmatpush.bf16.msra.mxu0 %v223_v1  ;;  %vm162_vm4 = vcmp.ge.s32.totalorder %v153_v20, 0 }
  0x12   :  { %129 = vmatpush.bf16.msra.mxu1 %v225_v4  ;;  %v222_v30 = vsel %vm162_vm4, 1.0, %v327_v29 }
  0x13   :  { %171 = vperm.xlu2 %235, %v222_v30  }
  0x14   :  { %212 = vmatmul.msk.bf16.vlgmr.msra.gmra.mxu0 %vm80_vm0, %v59_v2 }
  0x6d   :  { %v172_v38 = vpop.permute.xlu2 %171 }
  0x6e   :  { %v174_v39 = vsel %vm168_vm5, %v172_v38, 0.0 }
  0x91   :  { %v93_v6 = vpop.f32.mrf.mxu0 }
  0x92   :  { %v94_v7 = vadd.f32 %v236_v5, %v93_v6 }
  0x94   :  { %238 = vtanh.f32 %v94_v7 }
  0x99   :  { %v95_v8 = vpop.f32.mrf.mxu0 }
  0x9a   :  { %v239_v9 = vpop.eup %238 }
  0x9b   :  { %v98_v10 = vpack.c.bf16 %v239_v9, %v239_v9 }
  0x9d   :  { %221 = vmatmul.msk.bf16.vlgmr.msra.gmra.mxu1 %vm80_vm0, %v98_v10 }
 0x11a   :  { %v131_v15 = vpop.f32.mrf.mxu1 }
 0x11b   :  { %v132_v16 = vadd.f32 %v237_v14, %v131_v15 }
 0x11d   :  { %135 = vst [vmem:[#allocation7] sm:$0x3] %v132_v16  ;;  %v139_v17 = vsel %vm138_vm1, %v132_v16, -1e+30 }
 0x11e   :  { %v141_v18 = vsel %vm140_vm2, %v139_v17, -inf  ;;  %192 = dma.vmem_to_hbm [thread:$0]  %s188_s5, 32, %s190_s19, [#allocation4]  }
 0x11f   :  { %142 = vmax.xlane.f32.xlu0 %v141_v18 }
 0x122   :  { %v133_v19 = vpop.f32.mrf.mxu1 }
 0x133   :  { %155 = vperm.xlu0 %234, %v153_v20  }
 0x192   :  { %v143_v21 = vpop.xlane.xlu0 %142 }
 0x193   :  { %v144_v22 = vsub.f32 %v139_v17, %v143_v21 }
 0x195   :  { %v145_v23 = vmul.f32 1.442695, %v144_v22 }
 0x197   :  { %240 = vpow2.f32 %v145_v23 }
 0x19d   :  { %v241_v24 = vpop.eup %240 }
 0x19e   :  { %v147_v25 = vsel %vm140_vm2, %v241_v24, 0.0 }
 0x19f   :  { %148 = vadd.xlane.f32.xlu1 %v147_v25 }
 0x1a5   :  { %v156_v26 = vpop.permute.xlu0 %155 }
 0x1a6   :  { %vm157_vm3 = vcmp.eq.s32.totalorder %v137_v13, %v156_v26 }
 0x1a7   :  { %v158_v27 = vsel %vm157_vm3, %v132_v16, 0.0 }
 0x1a8   :  { %v159_v28 = vsel %vm140_vm2, %v158_v27, 0.0 }
 0x1a9   :  { %160 = vadd.xlane.f32.xlu1 %v159_v28 }
 0x212   :  { %v149_v31 = vpop.xlane.xlu1 %148 }
 0x213   :  { %242 = vlog2.f32 %v149_v31 }
 0x219   :  { %v243_v32 = vpop.eup %242 }
 0x21a   :  { %v151_v33 = vmul.f32 0.6931472, %v243_v32 }
 0x21c   :  { %v152_v34 = vadd.f32 %v151_v33, %v143_v21  ;;  %v161_v35 = vpop.xlane.xlu1 %160 }
 0x21e   :  { %v165_v36 = vsub.f32 %v152_v34, %v161_v35 }
 0x220   :  { %v166_v37 = vmul.f32 %v222_v30, %v165_v36 }
 0x222   :  { %177 = vperm.xlu2 %235, %v166_v37  }
 0x27c   :  { %v178_v40 = vpop.permute.xlu2 %177 }
 0x27d   :  { %v180_v41 = vsel %vm167_vm6, %v178_v40, %v174_v39 }
 0x27e   :  { %181 = vst [vmem:[%s403_s7] sm:$0x3] %v180_v41 }
 0x27f   :  { %320 = dma.done.wait [#allocation4], 32  }
 0x280   :  { %321 = vsyncadd [#allocation4], 4294967264 }
 0x281   :  { %201 = vsyncpa [#allocation3], 1 }
 0x282   :  { %202 = vsyncpa [#allocation6], 1 }
 0x283   :  { %203 = vsyncpa [#allocation4], 1 }

</bundles_post_ra>
